<compile_context>
chip_gen: v5e
topology: v5e:2x2
jax: 0.10.0
libtpu: 0.0.40
codegen_flags: <defaults>
</compile_context>

<pallas_src>
import numpy as np
import jax
import jax.numpy as jnp
from jax.experimental import pallas as pl
from jax.experimental.pallas import tpu as pltpu

NEG_SLOPE = 0.02      # LeakyReLU(0.02)
BN_EPS = 1e-5
OUT_LANES = 128       # pad the classifier output to a full lane width


def _leaky(v):
    return jnp.where(v > 0, v, NEG_SLOPE * v)


def _ru(x, m):
    return ((x + m - 1) // m) * m


def _choose_gpb(B):
    """Graphs per grid block.  Toy sizes -> one block (no per-step overhead);
    large B -> large multiple-of-8 blocks with >=2 grid steps so v7x's two
    TensorCores both get work under dimension_semantics=("parallel",)."""
    if B < 16:
        return B
    cap = min(B // 2, 1024)          # per-graph VMEM footprint ~1.5 KB -> few MiB max
    g = (cap // 8) * 8
    while g >= 8:
        if B % g == 0:
            return g
        g -= 8
    return B                          # no suitable divisor: fall back to one block


# ------------------------------ fused forward -------------------------------

def make_forward(meta):
    """Build the jitted fused forward from static layout metadata."""
    B, C, H = meta["B"], meta["C"], meta["H"]
    IT, IP, EI, PPG = meta["IT"], meta["IP"], meta["EI"], meta["PPG"]
    out_pad, DLANES = meta["out_pad"], meta["DLANES"]
    W_ROWS, F_ROWS = meta["W_ROWS"], meta["F_ROWS"]
    OFF_AT, OFF_PH, OFF_PA = meta["OFF_AT"], meta["OFF_PH"], meta["OFF_PA"]
    OFF_EA, OFF_T0, OFF_T1 = meta["OFF_EA"], meta["OFF_T0"], meta["OFF_T1"]
    OFF_RS, OFF_XP = meta["OFF_RS"], meta["OFF_XP"]
    R_EW, R_T0, R_T1 = meta["R_EW"], meta["R_T0"], meta["R_T1"]
    R_PH, R_PA, R_CW2, R_B = meta["R_PH"], meta["R_PA"], meta["R_CW2"], meta["R_B"]
    R_EB, R_CB, R_BNS, R_BNB, R_BPH, R_BPA = (R_B + i for i in range(6))

    gpb = _choose_gpb(B)
    grid = (B // gpb,)

    def kernel(d_ref, w_ref, f_ref, out_ref):
        f32 = jnp.float32

        # ---- team GCNConv: per-graph 2x2 normalized adjacency contracted with
        # VPU broadcast-FMAs (batched 2x2 matmuls are pathological MXU shapes);
        # W_t / b_t are pre-folded into the post_cat chunks on the host.
        xt0 = d_ref[:, OFF_T0:OFF_T0 + IT]
        xt1 = d_ref[:, OFF_T1:OFF_T1 + IT]
        a00 = d_ref[:, OFF_AT + 0:OFF_AT + 1]
        a01 = d_ref[:, OFF_AT + 1:OFF_AT + 2]
        a10 = d_ref[:, OFF_AT + 2:OFF_AT + 3]
        a11 = d_ref[:, OFF_AT + 3:OFF_AT + 4]
        t0 = a00 * xt0 + a01 * xt1                         # [G, IT]
        t1 = a10 * xt0 + a11 * xt1                         # [G, IT]

        # ---- player GCNConv + home/away global_mean_pool: (pool @ A_hat_p) was
        # pre-folded into poolA on the host and W_p / b_p into the post_cat
        # chunks, so the player path is PPG broadcast-FMAs over raw [G, IP]
        # features per side (no batched einsum, no [G,PPG,PPG] input).
        xpp = d_ref[:, OFF_XP:OFF_XP + IP]
        ph = d_ref[:, OFF_PH + 0:OFF_PH + 1] * xpp
        pa = d_ref[:, OFF_PA + 0:OFF_PA + 1] * xpp
        for p_i in range(1, PPG):
            xpp = d_ref[:, OFF_XP + p_i * IP:OFF_XP + (p_i + 1) * IP]
            ph = ph + d_ref[:, OFF_PH + p_i:OFF_PH + p_i + 1] * xpp
            pa = pa + d_ref[:, OFF_PA + p_i:OFF_PA + p_i + 1] * xpp

        # ---- edge_transform + LeakyReLU (nonlinearity -> cannot be folded)
        ea = _leaky(jnp.dot(d_ref[:, OFF_EA:OFF_EA + EI],
                            w_ref[R_EW:R_EW + EI, :],
                            preferred_element_type=f32)
                    + w_ref[R_EB:R_EB + 1, :])

        # ---- post_cat over the implicit 5H concat: each branch hits its own
        # (pre-folded) chunk weights via static ref slices; the 5H concat is never
        # materialized and the GCN biases live in the folded constant / per-graph bias.
        rs_h = d_ref[:, OFF_RS + 0:OFF_RS + 1]     # mean-pool row sums (1 if non-empty)
        rs_a = d_ref[:, OFF_RS + 1:OFF_RS + 2]
        h = (jnp.dot(t0, w_ref[R_T0:R_T0 + IT, :], preferred_element_type=f32)
             + jnp.dot(t1, w_ref[R_T1:R_T1 + IT, :], preferred_element_type=f32)
             + jnp.dot(ea, w_ref[R_CW2:R_CW2 + H, :], preferred_element_type=f32)
             + jnp.dot(ph, w_ref[R_PH:R_PH + IP, :], preferred_element_type=f32)
             + jnp.dot(pa, w_ref[R_PA:R_PA + IP, :], preferred_element_type=f32)
             + w_ref[R_CB:R_CB + 1, :]
             + rs_h * w_ref[R_BPH:R_BPH + 1, :]
             + rs_a * w_ref[R_BPA:R_BPA + 1, :])

        # ---- BatchNorm1d (eval, folded scale/shift) + LeakyReLU; Dropout == identity
        h = _leaky(h * w_ref[R_BNS:R_BNS + 1, :] + w_ref[R_BNB:R_BNB + 1, :])

        # ---- final_linear; weight/bias pre-padded to 128 lanes -> dense stores
        out_ref[...] = (jnp.dot(h, f_ref[0:H, :], preferred_element_type=f32)
                        + f_ref[H:H + 1, :])

    # Explicit VMEM budget (double-buffered data/out blocks + resident weight
    # slabs) so one config stays safe on v7x's 64 MiB physical VMEM.
    block_bytes = gpb * (DLANES + out_pad) * 4
    slab_bytes = 4 * (W_ROWS * H + F_ROWS * out_pad)
    vmem_limit = int(min(max(4 * (2 * block_bytes + 2 * slab_bytes), 16 << 20), 48 << 20))

    call = pl.pallas_call(
        kernel,
        out_shape=jax.ShapeDtypeStruct((B, out_pad), jnp.float32),
        grid_spec=pltpu.PrefetchScalarGridSpec(
            num_scalar_prefetch=0,
            grid=grid,
            in_specs=[
                pl.BlockSpec((gpb, DLANES), lambda g: (g, 0)),      # per-graph data slab
                pl.BlockSpec((W_ROWS, H), lambda g: (0, 0)),        # packed H-wide weights
                pl.BlockSpec((F_ROWS, out_pad), lambda g: (0, 0)),  # final_linear slab
            ],
            out_specs=pl.BlockSpec((gpb, out_pad), lambda g: (g, 0)),
        ),
        compiler_params=pltpu.CompilerParams(
            dimension_semantics=("parallel",),
            vmem_limit_bytes=vmem_limit,
        ),
    )

    @jax.jit
    def forward(data_slab, wslab, fslab):
        return call(data_slab, wslab, fslab)[:, :C]

    return forward


# -------------------------- one-time host prep ------------------------------

def gcn_dense_adj(edge_index, num_nodes):
    """Dense PyG-style GCN adjacency with self-loops + symmetric normalization."""
    src = np.concatenate([np.asarray(edge_index[0]), np.arange(num_nodes)])
    dst = np.concatenate([np.asarray(edge_index[1]), np.arange(num_nodes)])
    deg = np.zeros(num_nodes, np.float64)
    np.add.at(deg, dst, 1.0)
    dinv = 1.0 / np.sqrt(deg)
    a = np.zeros((num_nodes, num_nodes), np.float32)
    a[dst, src] = (dinv[src] * dinv[dst]).astype(np.float32)
    return a


def _block_diag(a, num_graphs, npg):
    blk = a.reshape(num_graphs, npg, num_graphs, npg)
    idx = np.arange(num_graphs)
    diag = blk[idx, :, idx, :]                       # [G, npg, npg]
    off = blk.copy()
    off[idx, :, idx, :] = 0.0
    assert np.all(off == 0.0), "adjacency is not block-diagonal per graph"
    return np.ascontiguousarray(diag.astype(np.float32))


def _pool_row(sel_idx, player_batch, num_graphs, ppg):
    """Per-graph mean-pool weights over the selected players.
    Returns ([B, ppg] weights, [B] non-empty indicator used for the bias fold)."""
    n_p = player_batch.shape[0]
    m = np.zeros((num_graphs, n_p), np.float32)
    if sel_idx.size:
        m[player_batch[sel_idx], sel_idx] = 1.0
    cnt = m.sum(axis=1)
    m = m / np.maximum(cnt[:, None], 1.0)
    mb = m.reshape(num_graphs, num_graphs, ppg)
    idx = np.arange(num_graphs)
    diag = mb[idx, idx, :]
    off = mb.copy()
    off[idx, idx, :] = 0.0
    assert np.all(off == 0.0), "pooled players must belong to their own graph"
    return np.ascontiguousarray(diag.astype(np.float32)), (cnt > 0).astype(np.float32)


def prepare_inputs(params, data):
    """Host-side prep done ONCE: adjacency normalization + block-diagonal
    extraction, mean-pool folding through A_hat_p, GCN/post_cat/BN weight
    folding into two packed slabs, and packing of all per-graph data into one
    lane-dense slab."""
    B = int(data["num_graphs"])
    x_team = np.asarray(data["x_team"], np.float32)
    x_player = np.asarray(data["x_player"], np.float32)
    edge_attr = np.asarray(data["edge_attr_tt"], np.float32)
    ei_tt = np.asarray(data["edge_index_tt"])
    ei_pp = np.asarray(data["edge_index_pp"])
    ei_pt = np.asarray(data["edge_index_pt"])
    pb = np.asarray(data["player_batch"])

    n_t, n_p = x_team.shape[0], x_player.shape[0]
    tpg, ppg = n_t // B, n_p // B
    IT, IP, EI = x_team.shape[1], x_player.shape[1], edge_attr.shape[1]
    assert tpg == 2, "forward's per-graph concat assumes 2 teams per graph"
    # The reference indexes edge_attr[i] per graph and uses player->team edge
    # *positions* as player indices; only meaningful for this batch layout:
    assert edge_attr.shape[0] >= B, "need one team-team edge-attr row per graph"
    assert np.array_equal(ei_pt[0], np.arange(n_p)), \
        "expected exactly one player->team edge per player, in player order"

    A_team_blk = _block_diag(gcn_dense_adj(ei_tt, n_t), B, tpg)        # [B,2,2]
    A_player_blk = _block_diag(gcn_dense_adj(ei_pp, n_p), B, ppg)      # [B,ppg,ppg]

    edge_sel = edge_attr[:B]                                           # rows used by forward

    home_idx = np.nonzero(ei_pt[1] % 2 == 0)[0]
    away_idx = np.nonzero(ei_pt[1] % 2 == 1)[0]
    pool_home, rs_home = _pool_row(home_idx, pb, B, ppg)
    pool_away, rs_away = _pool_row(away_idx, pb, B, ppg)
    # pooled = pool @ (A_hat X W + 1 b) = (pool @ A_hat) X W + rowsum(pool) * b
    poolA_home = np.einsum('bp,bpq->bq', pool_home, A_player_blk)
    poolA_away = np.einsum('bp,bpq->bq', pool_away, A_player_blk)

    # ---------------- weight folding ----------------
    p = {k: np.asarray(v, np.float32) for k, v in params.items()}
    H = p["gcn_team_w"].shape[0]
    C = p["final_w"].shape[0]
    cw = np.ascontiguousarray(p["post_cat_w"].T)                        # [5H, H]
    cw0, cw1, cw2, cw3, cw4 = (cw[i * H:(i + 1) * H] for i in range(5))

    bn_scale = p["bn_gamma"] / np.sqrt(p["bn_var"] + BN_EPS)
    bn_bias = p["bn_beta"] - p["bn_mean"] * bn_scale

    R_EW = 0
    R_T0 = R_EW + _ru(EI, 8)
    R_T1 = R_T0 + _ru(IT, 8)
    R_PH = R_T1 + _ru(IT, 8)
    R_PA = R_PH + _ru(IP, 8)
    R_CW2 = R_PA + _ru(IP, 8)
    R_B = R_CW2 + _ru(H, 8)
    W_ROWS = R_B + 8

    wslab = np.zeros((W_ROWS, H), np.float32)
    wslab[R_EW:R_EW + EI] = p["edge_w"].T
    wslab[R_T0:R_T0 + IT] = p["gcn_team_w"].T @ cw0       # W_t folded into post_cat chunk 0
    wslab[R_T1:R_T1 + IT] = p["gcn_team_w"].T @ cw1       # W_t folded into post_cat chunk 1
    wslab[R_PH:R_PH + IP] = p["gcn_player_w"].T @ cw3     # W_p folded into post_cat chunk 3
    wslab[R_PA:R_PA + IP] = p["gcn_player_w"].T @ cw4     # W_p folded into post_cat chunk 4
    wslab[R_CW2:R_CW2 + H] = cw2                           # edge chunk (LeakyReLU blocks folding)
    wslab[R_B + 0] = p["edge_b"]
    wslab[R_B + 1] = p["post_cat_b"] + p["gcn_team_b"] @ cw0 + p["gcn_team_b"] @ cw1
    wslab[R_B + 2] = bn_scale
    wslab[R_B + 3] = bn_bias
    wslab[R_B + 4] = p["gcn_player_b"] @ cw3               # scaled by pool row-sum per graph
    wslab[R_B + 5] = p["gcn_player_b"] @ cw4

    out_pad = _ru(C, OUT_LANES)
    F_ROWS = _ru(H + 1, 8)
    fslab = np.zeros((F_ROWS, out_pad), np.float32)
    fslab[:H, :C] = p["final_w"].T
    fslab[H, :C] = p["final_b"]

    # ---------------- per-graph data slab (lane-dense, one DMA stream) -------
    OFF_AT = 0
    OFF_PH = OFF_AT + _ru(4, 8)
    OFF_PA = OFF_PH + _ru(ppg, 8)
    OFF_EA = OFF_PA + _ru(ppg, 8)
    OFF_T0 = OFF_EA + _ru(EI, 8)
    OFF_T1 = OFF_T0 + _ru(IT, 8)
    OFF_RS = OFF_T1 + _ru(IT, 8)
    OFF_XP = _ru(OFF_RS + 2, 128)
    DLANES = _ru(OFF_XP + ppg * IP, 128)

    slab = np.zeros((B, DLANES), np.float32)
    slab[:, OFF_AT:OFF_AT + 4] = A_team_blk.reshape(B, 4)
    slab[:, OFF_PH:OFF_PH + ppg] = poolA_home
    slab[:, OFF_PA:OFF_PA + ppg] = poolA_away
    slab[:, OFF_EA:OFF_EA + EI] = edge_sel
    slab[:, OFF_T0:OFF_T0 + IT] = x_team[0::2]
    slab[:, OFF_T1:OFF_T1 + IT] = x_team[1::2]
    slab[:, OFF_RS + 0] = rs_home
    slab[:, OFF_RS + 1] = rs_away
    slab[:, OFF_XP:OFF_XP + ppg * IP] = x_player.reshape(B, ppg * IP)

    prep = {"data": jnp.asarray(slab),
            "wslab": jnp.asarray(wslab),
            "fslab": jnp.asarray(fslab)}
    meta = dict(B=B, C=C, H=H, IT=IT, IP=IP, EI=EI, PPG=ppg,
                out_pad=out_pad, DLANES=DLANES, W_ROWS=W_ROWS, F_ROWS=F_ROWS,
                OFF_AT=OFF_AT, OFF_PH=OFF_PH, OFF_PA=OFF_PA, OFF_EA=OFF_EA,
                OFF_T0=OFF_T0, OFF_T1=OFF_T1, OFF_RS=OFF_RS, OFF_XP=OFF_XP,
                R_EW=R_EW, R_T0=R_T0, R_T1=R_T1, R_PH=R_PH, R_PA=R_PA,
                R_CW2=R_CW2, R_B=R_B)
    return prep, meta


# ------------------------------- reference ----------------------------------

def reference_forward(p, data):
    """Plain-jnp reference mirroring the PyTorch forward (eval mode), dense adjacency."""
    leaky = lambda x: jnp.where(x > 0, x, NEG_SLOPE * x)
    B = data["num_graphs"]
    A_t = jnp.asarray(gcn_dense_adj(np.asarray(data["edge_index_tt"]), data["x_team"].shape[0]))
    A_p = jnp.asarray(gcn_dense_adj(np.asarray(data["edge_index_pp"]), data["x_player"].shape[0]))
    with jax.default_matmul_precision("highest"):
        ea = leaky(data["edge_attr_tt"] @ p["edge_w"].T + p["edge_b"])
        xt = A_t @ (data["x_team"] @ p["gcn_team_w"].T) + p["gcn_team_b"]
        xp = A_p @ (data["x_player"] @ p["gcn_player_w"].T) + p["gcn_player_b"]
        ei_pt = np.asarray(data["edge_index_pt"])
        home_idx = np.nonzero(ei_pt[1] % 2 == 0)[0]
        away_idx = np.nonzero(ei_pt[1] % 2 == 1)[0]
        pb = np.asarray(data["player_batch"])

        def mean_pool(x_sel, batch_sel):
            m = np.zeros((B, batch_sel.shape[0]), np.float32)
            m[batch_sel, np.arange(batch_sel.shape[0])] = 1.0
            m = m / np.maximum(m.sum(1, keepdims=True), 1.0)
            return jnp.asarray(m) @ x_sel

        xph = mean_pool(xp[jnp.asarray(home_idx)], pb[home_idx])
        xpa = mean_pool(xp[jnp.asarray(away_idx)], pb[away_idx])
        xcat = jnp.concatenate([xt[0::2][:B], xt[1::2][:B], ea[:B], xph, xpa], axis=-1)
        h = xcat @ p["post_cat_w"].T + p["post_cat_b"]
        h = (h - p["bn_mean"]) / jnp.sqrt(p["bn_var"] + BN_EPS) * p["bn_gamma"] + p["bn_beta"]
        h = leaky(h)
        return h @ p["final_w"].T + p["final_b"]


# --------------------------- params / data set-up ---------------------------

def init_params(key, in_team, in_player, edge_in, hidden, num_classes):
    ks = jax.random.split(key, 9)

    def lin(k, out_f, in_f):
        kw, kb = jax.random.split(k)
        w = jax.random.normal(kw, (out_f, in_f), jnp.float32) / np.sqrt(in_f)
        b = 0.05 * jax.random.normal(kb, (out_f,), jnp.float32)
        return w, b

    p = {}
    p["gcn_team_w"], p["gcn_team_b"] = lin(ks[0], hidden, in_team)
    p["gcn_player_w"], p["gcn_player_b"] = lin(ks[1], hidden, in_player)
    p["edge_w"], p["edge_b"] = lin(ks[2], hidden, edge_in)
    p["post_cat_w"], p["post_cat_b"] = lin(ks[3], hidden, hidden * 5)
    p["final_w"], p["final_b"] = lin(ks[4], num_classes, hidden)
    p["bn_gamma"] = 1.0 + 0.1 * jax.random.normal(ks[5], (hidden,), jnp.float32)
    p["bn_beta"] = 0.1 * jax.random.normal(ks[6], (hidden,), jnp.float32)
    p["bn_mean"] = 0.1 * jax.random.normal(ks[7], (hidden,), jnp.float32)
    p["bn_var"] = 0.5 + 0.1 * jnp.abs(jax.random.normal(ks[8], (hidden,), jnp.float32))
    return p


def make_data(key, num_graphs, teams_per_graph=2, players_per_graph=8,
              in_team=8, in_player=16, edge_in=8):
    B = num_graphs
    n_t = B * teams_per_graph
    n_p = B * players_per_graph
    k1, k2, k3 = jax.random.split(key, 3)
    x_team = jax.random.normal(k1, (n_t, in_team), jnp.float32)
    x_player = jax.random.normal(k2, (n_p, in_player), jnp.float32)

    # team<->team edges (one pair of directed edges per graph)
    src_tt, dst_tt = [], []
    for i in range(B):
        src_tt += [2 * i, 2 * i + 1]
        dst_tt += [2 * i + 1, 2 * i]
    ei_tt = np.array([src_tt, dst_tt], np.int64)
    edge_attr_tt = jax.random.normal(k3, (ei_tt.shape[1], edge_in), jnp.float32)

    # player<->player edges: bidirectional ring within each graph
    src_pp, dst_pp = [], []
    for i in range(B):
        base = i * players_per_graph
        for j in range(players_per_graph):
            a, b = base + j, base + (j + 1) % players_per_graph
            src_pp += [a, b]
            dst_pp += [b, a]
    ei_pp = np.array([src_pp, dst_pp], np.int64)

    # player->team edges: one per player; first half of each graph -> home team
    src_pt = np.arange(n_p)
    dst_pt = np.array(
        [2 * (q // players_per_graph) + (0 if (q % players_per_graph) < players_per_graph // 2 else 1)
         for q in range(n_p)], np.int64)
    ei_pt = np.array([src_pt, dst_pt], np.int64)

    return dict(
        num_graphs=B, x_team=x_team, x_player=x_player,
        edge_attr_tt=edge_attr_tt, edge_index_tt=ei_tt,
        edge_index_pp=ei_pp, edge_index_pt=ei_pt,
        player_batch=np.arange(n_p) // players_per_graph,
        team_batch=np.arange(n_t) // teams_per_graph,
    )


# ----------------------------------- main -----------------------------------

if __name__ == "__main__":
    key = jax.random.PRNGKey(0)
    k_data, k_param = jax.random.split(key)

    B = 2
    hidden = 32
    num_classes = 4
    in_team, in_player, edge_in = 8, 16, 8

    data = make_data(k_data, B, in_team=in_team, in_player=in_player, edge_in=edge_in)
    params = init_params(k_param, in_team, in_player, edge_in, hidden, num_classes)

    prep, meta = prepare_inputs(params, data)          # one-time host prep
    forward = make_forward(meta)                       # jitted fused pallas_call

    out = forward(prep["data"], prep["wslab"], prep["fslab"])
    out = jax.block_until_ready(out)

    ref = reference_forward(params, data)
    assert out.shape == (B, num_classes)
    assert bool(jnp.all(jnp.isfinite(out)))
    assert np.allclose(np.asarray(out), np.asarray(ref), atol=1e-2, rtol=1e-2)

    print("KERNEL_OK")
</pallas_src>

<mosaic_0001>
module attributes {stable_mosaic.version = 11 : i64} {
  func.func @kernel(%arg0: i32, %arg1: memref<2x256xf32, #tpu.memory_space<vmem>>, %arg2: memref<96x32xf32, #tpu.memory_space<vmem>>, %arg3: memref<40x128xf32, #tpu.memory_space<vmem>>, %arg4: memref<2x128xf32, #tpu.memory_space<vmem>>) attributes {dimension_semantics = [#tpu.dimension_semantics<parallel>], iteration_bounds = array<i64: 1>, scalar_prefetch = 0 : i64, scratch_operands = 0 : i64, tpu.core_type = #tpu.core_type<tc>, window_params = [{transform_indices = @transform_0, window_bounds = array<i64: 2, 256>}, {pipeline_mode = #tpu.pipeline_mode<synchronous>, transform_indices = @transform_1, window_bounds = array<i64: 96, 32>}, {pipeline_mode = #tpu.pipeline_mode<synchronous>, transform_indices = @transform_2, window_bounds = array<i64: 40, 128>}, {transform_indices = @transform_3, window_bounds = array<i64: 2, 128>}]} {
    %c0 = arith.constant 0 : index
    %c32 = arith.constant 32 : index
    %0 = vector.load %arg1[%c0, %c32] : memref<2x256xf32, #tpu.memory_space<vmem>>, vector<2x8xf32>
    %c0_0 = arith.constant 0 : index
    %c40 = arith.constant 40 : index
    %1 = vector.load %arg1[%c0_0, %c40] : memref<2x256xf32, #tpu.memory_space<vmem>>, vector<2x8xf32>
    %c0_1 = arith.constant 0 : index
    %c0_2 = arith.constant 0 : index
    %2 = vector.load %arg1[%c0_1, %c0_2] : memref<2x256xf32, #tpu.memory_space<vmem>>, vector<2x1xf32>
    %c0_3 = arith.constant 0 : index
    %c1 = arith.constant 1 : index
    %3 = vector.load %arg1[%c0_3, %c1] : memref<2x256xf32, #tpu.memory_space<vmem>>, vector<2x1xf32>
    %c0_4 = arith.constant 0 : index
    %c2 = arith.constant 2 : index
    %4 = vector.load %arg1[%c0_4, %c2] : memref<2x256xf32, #tpu.memory_space<vmem>>, vector<2x1xf32>
    %c0_5 = arith.constant 0 : index
    %c3 = arith.constant 3 : index
    %5 = vector.load %arg1[%c0_5, %c3] : memref<2x256xf32, #tpu.memory_space<vmem>>, vector<2x1xf32>
    %6 = vector.broadcast %2 : vector<2x1xf32> to vector<2x8xf32>
    %7 = arith.mulf %6, %0 : vector<2x8xf32>
    %8 = vector.broadcast %3 : vector<2x1xf32> to vector<2x8xf32>
    %9 = arith.mulf %8, %1 : vector<2x8xf32>
    %10 = arith.addf %7, %9 : vector<2x8xf32>
    %11 = vector.broadcast %4 : vector<2x1xf32> to vector<2x8xf32>
    %12 = arith.mulf %11, %0 : vector<2x8xf32>
    %13 = vector.broadcast %5 : vector<2x1xf32> to vector<2x8xf32>
    %14 = arith.mulf %13, %1 : vector<2x8xf32>
    %15 = arith.addf %12, %14 : vector<2x8xf32>
    %c0_6 = arith.constant 0 : index
    %c128 = arith.constant 128 : index
    %16 = vector.load %arg1[%c0_6, %c128] : memref<2x256xf32, #tpu.memory_space<vmem>>, vector<2x16xf32>
    %c0_7 = arith.constant 0 : index
    %c8 = arith.constant 8 : index
    %17 = vector.load %arg1[%c0_7, %c8] : memref<2x256xf32, #tpu.memory_space<vmem>>, vector<2x1xf32>
    %18 = vector.broadcast %17 : vector<2x1xf32> to vector<2x16xf32>
    %19 = arith.mulf %18, %16 : vector<2x16xf32>
    %c0_8 = arith.constant 0 : index
    %c16 = arith.constant 16 : index
    %20 = vector.load %arg1[%c0_8, %c16] : memref<2x256xf32, #tpu.memory_space<vmem>>, vector<2x1xf32>
    %21 = vector.broadcast %20 : vector<2x1xf32> to vector<2x16xf32>
    %22 = arith.mulf %21, %16 : vector<2x16xf32>
    %c0_9 = arith.constant 0 : index
    %c144 = arith.constant 144 : index
    %23 = vector.load %arg1[%c0_9, %c144] : memref<2x256xf32, #tpu.memory_space<vmem>>, vector<2x16xf32>
    %c0_10 = arith.constant 0 : index
    %c9 = arith.constant 9 : index
    %24 = vector.load %arg1[%c0_10, %c9] : memref<2x256xf32, #tpu.memory_space<vmem>>, vector<2x1xf32>
    %25 = vector.broadcast %24 : vector<2x1xf32> to vector<2x16xf32>
    %26 = arith.mulf %25, %23 : vector<2x16xf32>
    %27 = arith.addf %19, %26 : vector<2x16xf32>
    %c0_11 = arith.constant 0 : index
    %c17 = arith.constant 17 : index
    %28 = vector.load %arg1[%c0_11, %c17] : memref<2x256xf32, #tpu.memory_space<vmem>>, vector<2x1xf32>
    %29 = vector.broadcast %28 : vector<2x1xf32> to vector<2x16xf32>
    %30 = arith.mulf %29, %23 : vector<2x16xf32>
    %31 = arith.addf %22, %30 : vector<2x16xf32>
    %c0_12 = arith.constant 0 : index
    %c160 = arith.constant 160 : index
    %32 = vector.load %arg1[%c0_12, %c160] : memref<2x256xf32, #tpu.memory_space<vmem>>, vector<2x16xf32>
    %c0_13 = arith.constant 0 : index
    %c10 = arith.constant 10 : index
    %33 = vector.load %arg1[%c0_13, %c10] : memref<2x256xf32, #tpu.memory_space<vmem>>, vector<2x1xf32>
    %34 = vector.broadcast %33 : vector<2x1xf32> to vector<2x16xf32>
    %35 = arith.mulf %34, %32 : vector<2x16xf32>
    %36 = arith.addf %27, %35 : vector<2x16xf32>
    %c0_14 = arith.constant 0 : index
    %c18 = arith.constant 18 : index
    %37 = vector.load %arg1[%c0_14, %c18] : memref<2x256xf32, #tpu.memory_space<vmem>>, vector<2x1xf32>
    %38 = vector.broadcast %37 : vector<2x1xf32> to vector<2x16xf32>
    %39 = arith.mulf %38, %32 : vector<2x16xf32>
    %40 = arith.addf %31, %39 : vector<2x16xf32>
    %c0_15 = arith.constant 0 : index
    %c176 = arith.constant 176 : index
    %41 = vector.load %arg1[%c0_15, %c176] : memref<2x256xf32, #tpu.memory_space<vmem>>, vector<2x16xf32>
    %c0_16 = arith.constant 0 : index
    %c11 = arith.constant 11 : index
    %42 = vector.load %arg1[%c0_16, %c11] : memref<2x256xf32, #tpu.memory_space<vmem>>, vector<2x1xf32>
    %43 = vector.broadcast %42 : vector<2x1xf32> to vector<2x16xf32>
    %44 = arith.mulf %43, %41 : vector<2x16xf32>
    %45 = arith.addf %36, %44 : vector<2x16xf32>
    %c0_17 = arith.constant 0 : index
    %c19 = arith.constant 19 : index
    %46 = vector.load %arg1[%c0_17, %c19] : memref<2x256xf32, #tpu.memory_space<vmem>>, vector<2x1xf32>
    %47 = vector.broadcast %46 : vector<2x1xf32> to vector<2x16xf32>
    %48 = arith.mulf %47, %41 : vector<2x16xf32>
    %49 = arith.addf %40, %48 : vector<2x16xf32>
    %c0_18 = arith.constant 0 : index
    %c192 = arith.constant 192 : index
    %50 = vector.load %arg1[%c0_18, %c192] : memref<2x256xf32, #tpu.memory_space<vmem>>, vector<2x16xf32>
    %c0_19 = arith.constant 0 : index
    %c12 = arith.constant 12 : index
    %51 = vector.load %arg1[%c0_19, %c12] : memref<2x256xf32, #tpu.memory_space<vmem>>, vector<2x1xf32>
    %52 = vector.broadcast %51 : vector<2x1xf32> to vector<2x16xf32>
    %53 = arith.mulf %52, %50 : vector<2x16xf32>
    %54 = arith.addf %45, %53 : vector<2x16xf32>
    %c0_20 = arith.constant 0 : index
    %c20 = arith.constant 20 : index
    %55 = vector.load %arg1[%c0_20, %c20] : memref<2x256xf32, #tpu.memory_space<vmem>>, vector<2x1xf32>
    %56 = vector.broadcast %55 : vector<2x1xf32> to vector<2x16xf32>
    %57 = arith.mulf %56, %50 : vector<2x16xf32>
    %58 = arith.addf %49, %57 : vector<2x16xf32>
    %c0_21 = arith.constant 0 : index
    %c208 = arith.constant 208 : index
    %59 = vector.load %arg1[%c0_21, %c208] : memref<2x256xf32, #tpu.memory_space<vmem>>, vector<2x16xf32>
    %c0_22 = arith.constant 0 : index
    %c13 = arith.constant 13 : index
    %60 = vector.load %arg1[%c0_22, %c13] : memref<2x256xf32, #tpu.memory_space<vmem>>, vector<2x1xf32>
    %61 = vector.broadcast %60 : vector<2x1xf32> to vector<2x16xf32>
    %62 = arith.mulf %61, %59 : vector<2x16xf32>
    %63 = arith.addf %54, %62 : vector<2x16xf32>
    %c0_23 = arith.constant 0 : index
    %c21 = arith.constant 21 : index
    %64 = vector.load %arg1[%c0_23, %c21] : memref<2x256xf32, #tpu.memory_space<vmem>>, vector<2x1xf32>
    %65 = vector.broadcast %64 : vector<2x1xf32> to vector<2x16xf32>
    %66 = arith.mulf %65, %59 : vector<2x16xf32>
    %67 = arith.addf %58, %66 : vector<2x16xf32>
    %c0_24 = arith.constant 0 : index
    %c224 = arith.constant 224 : index
    %68 = vector.load %arg1[%c0_24, %c224] : memref<2x256xf32, #tpu.memory_space<vmem>>, vector<2x16xf32>
    %c0_25 = arith.constant 0 : index
    %c14 = arith.constant 14 : index
    %69 = vector.load %arg1[%c0_25, %c14] : memref<2x256xf32, #tpu.memory_space<vmem>>, vector<2x1xf32>
    %70 = vector.broadcast %69 : vector<2x1xf32> to vector<2x16xf32>
    %71 = arith.mulf %70, %68 : vector<2x16xf32>
    %72 = arith.addf %63, %71 : vector<2x16xf32>
    %c0_26 = arith.constant 0 : index
    %c22 = arith.constant 22 : index
    %73 = vector.load %arg1[%c0_26, %c22] : memref<2x256xf32, #tpu.memory_space<vmem>>, vector<2x1xf32>
    %74 = vector.broadcast %73 : vector<2x1xf32> to vector<2x16xf32>
    %75 = arith.mulf %74, %68 : vector<2x16xf32>
    %76 = arith.addf %67, %75 : vector<2x16xf32>
    %c0_27 = arith.constant 0 : index
    %c240 = arith.constant 240 : index
    %77 = vector.load %arg1[%c0_27, %c240] : memref<2x256xf32, #tpu.memory_space<vmem>>, vector<2x16xf32>
    %c0_28 = arith.constant 0 : index
    %c15 = arith.constant 15 : index
    %78 = vector.load %arg1[%c0_28, %c15] : memref<2x256xf32, #tpu.memory_space<vmem>>, vector<2x1xf32>
    %79 = vector.broadcast %78 : vector<2x1xf32> to vector<2x16xf32>
    %80 = arith.mulf %79, %77 : vector<2x16xf32>
    %81 = arith.addf %72, %80 : vector<2x16xf32>
    %c0_29 = arith.constant 0 : index
    %c23 = arith.constant 23 : index
    %82 = vector.load %arg1[%c0_29, %c23] : memref<2x256xf32, #tpu.memory_space<vmem>>, vector<2x1xf32>
    %83 = vector.broadcast %82 : vector<2x1xf32> to vector<2x16xf32>
    %84 = arith.mulf %83, %77 : vector<2x16xf32>
    %85 = arith.addf %76, %84 : vector<2x16xf32>
    %c0_30 = arith.constant 0 : index
    %c24 = arith.constant 24 : index
    %86 = vector.load %arg1[%c0_30, %c24] : memref<2x256xf32, #tpu.memory_space<vmem>>, vector<2x8xf32>
    %c0_31 = arith.constant 0 : index
    %c0_32 = arith.constant 0 : index
    %87 = vector.load %arg2[%c0_31, %c0_32] : memref<96x32xf32, #tpu.memory_space<vmem>>, vector<8x32xf32>
    %cst = arith.constant dense<0.000000e+00> : vector<2x32xf32>
    %88 = tpu.matmul %86, %87, %cst {dimension_numbers = #tpu.dot_dimension_numbers<[1], [0], [0], [1], [0, 0, 1, 1], [], []>} : vector<2x8xf32>, vector<8x32xf32>, vector<2x32xf32> -> vector<2x32xf32>
    %c88 = arith.constant 88 : index
    %c0_33 = arith.constant 0 : index
    %89 = vector.load %arg2[%c88, %c0_33] : memref<96x32xf32, #tpu.memory_space<vmem>>, vector<1x32xf32>
    %90 = vector.broadcast %89 : vector<1x32xf32> to vector<2x32xf32>
    %91 = arith.addf %88, %90 : vector<2x32xf32>
    %cst_34 = arith.constant 0.000000e+00 : f32
    %92 = vector.broadcast %cst_34 : f32 to vector<2x32xf32>
    %93 = arith.cmpf ogt, %91, %92 : vector<2x32xf32>
    %cst_35 = arith.constant 2.000000e-02 : f32
    %94 = vector.broadcast %cst_35 : f32 to vector<2x32xf32>
    %95 = arith.mulf %94, %91 : vector<2x32xf32>
    %96 = arith.select %93, %91, %95 : vector<2x32xi1>, vector<2x32xf32>
    %c0_36 = arith.constant 0 : index
    %c48 = arith.constant 48 : index
    %97 = vector.load %arg1[%c0_36, %c48] : memref<2x256xf32, #tpu.memory_space<vmem>>, vector<2x1xf32>
    %c0_37 = arith.constant 0 : index
    %c49 = arith.constant 49 : index
    %98 = vector.load %arg1[%c0_37, %c49] : memref<2x256xf32, #tpu.memory_space<vmem>>, vector<2x1xf32>
    %c8_38 = arith.constant 8 : index
    %c0_39 = arith.constant 0 : index
    %99 = vector.load %arg2[%c8_38, %c0_39] : memref<96x32xf32, #tpu.memory_space<vmem>>, vector<8x32xf32>
    %cst_40 = arith.constant dense<0.000000e+00> : vector<2x32xf32>
    %100 = tpu.matmul %10, %99, %cst_40 {dimension_numbers = #tpu.dot_dimension_numbers<[1], [0], [0], [1], [0, 0, 1, 1], [], []>} : vector<2x8xf32>, vector<8x32xf32>, vector<2x32xf32> -> vector<2x32xf32>
    %c16_41 = arith.constant 16 : index
    %c0_42 = arith.constant 0 : index
    %101 = vector.load %arg2[%c16_41, %c0_42] : memref<96x32xf32, #tpu.memory_space<vmem>>, vector<8x32xf32>
    %cst_43 = arith.constant dense<0.000000e+00> : vector<2x32xf32>
    %102 = tpu.matmul %15, %101, %cst_43 {dimension_numbers = #tpu.dot_dimension_numbers<[1], [0], [0], [1], [0, 0, 1, 1], [], []>} : vector<2x8xf32>, vector<8x32xf32>, vector<2x32xf32> -> vector<2x32xf32>
    %103 = arith.addf %100, %102 : vector<2x32xf32>
    %c56 = arith.constant 56 : index
    %c0_44 = arith.constant 0 : index
    %104 = vector.load %arg2[%c56, %c0_44] : memref<96x32xf32, #tpu.memory_space<vmem>>, vector<32x32xf32>
    %cst_45 = arith.constant dense<0.000000e+00> : vector<2x32xf32>
    %105 = tpu.matmul %96, %104, %cst_45 {dimension_numbers = #tpu.dot_dimension_numbers<[1], [0], [0], [1], [0, 0, 1, 1], [], []>} : vector<2x32xf32>, vector<32x32xf32>, vector<2x32xf32> -> vector<2x32xf32>
    %106 = arith.addf %103, %105 : vector<2x32xf32>
    %c24_46 = arith.constant 24 : index
    %c0_47 = arith.constant 0 : index
    %107 = vector.load %arg2[%c24_46, %c0_47] : memref<96x32xf32, #tpu.memory_space<vmem>>, vector<16x32xf32>
    %cst_48 = arith.constant dense<0.000000e+00> : vector<2x32xf32>
    %108 = tpu.matmul %81, %107, %cst_48 {dimension_numbers = #tpu.dot_dimension_numbers<[1], [0], [0], [1], [0, 0, 1, 1], [], []>} : vector<2x16xf32>, vector<16x32xf32>, vector<2x32xf32> -> vector<2x32xf32>
    %109 = arith.addf %106, %108 : vector<2x32xf32>
    %c40_49 = arith.constant 40 : index
    %c0_50 = arith.constant 0 : index
    %110 = vector.load %arg2[%c40_49, %c0_50] : memref<96x32xf32, #tpu.memory_space<vmem>>, vector<16x32xf32>
    %cst_51 = arith.constant dense<0.000000e+00> : vector<2x32xf32>
    %111 = tpu.matmul %85, %110, %cst_51 {dimension_numbers = #tpu.dot_dimension_numbers<[1], [0], [0], [1], [0, 0, 1, 1], [], []>} : vector<2x16xf32>, vector<16x32xf32>, vector<2x32xf32> -> vector<2x32xf32>
    %112 = arith.addf %109, %111 : vector<2x32xf32>
    %c89 = arith.constant 89 : index
    %c0_52 = arith.constant 0 : index
    %113 = vector.load %arg2[%c89, %c0_52] : memref<96x32xf32, #tpu.memory_space<vmem>>, vector<1x32xf32>
    %114 = vector.broadcast %113 : vector<1x32xf32> to vector<2x32xf32>
    %115 = arith.addf %112, %114 : vector<2x32xf32>
    %c92 = arith.constant 92 : index
    %c0_53 = arith.constant 0 : index
    %116 = vector.load %arg2[%c92, %c0_53] : memref<96x32xf32, #tpu.memory_space<vmem>>, vector<1x32xf32>
    %117 = vector.broadcast %97 : vector<2x1xf32> to vector<2x32xf32>
    %118 = vector.broadcast %116 : vector<1x32xf32> to vector<2x32xf32>
    %119 = arith.mulf %117, %118 : vector<2x32xf32>
    %120 = arith.addf %115, %119 : vector<2x32xf32>
    %c93 = arith.constant 93 : index
    %c0_54 = arith.constant 0 : index
    %121 = vector.load %arg2[%c93, %c0_54] : memref<96x32xf32, #tpu.memory_space<vmem>>, vector<1x32xf32>
    %122 = vector.broadcast %98 : vector<2x1xf32> to vector<2x32xf32>
    %123 = vector.broadcast %121 : vector<1x32xf32> to vector<2x32xf32>
    %124 = arith.mulf %122, %123 : vector<2x32xf32>
    %125 = arith.addf %120, %124 : vector<2x32xf32>
    %c90 = arith.constant 90 : index
    %c0_55 = arith.constant 0 : index
    %126 = vector.load %arg2[%c90, %c0_55] : memref<96x32xf32, #tpu.memory_space<vmem>>, vector<1x32xf32>
    %127 = vector.broadcast %126 : vector<1x32xf32> to vector<2x32xf32>
    %128 = arith.mulf %125, %127 : vector<2x32xf32>
    %c91 = arith.constant 91 : index
    %c0_56 = arith.constant 0 : index
    %129 = vector.load %arg2[%c91, %c0_56] : memref<96x32xf32, #tpu.memory_space<vmem>>, vector<1x32xf32>
    %130 = vector.broadcast %129 : vector<1x32xf32> to vector<2x32xf32>
    %131 = arith.addf %128, %130 : vector<2x32xf32>
    %cst_57 = arith.constant 0.000000e+00 : f32
    %132 = vector.broadcast %cst_57 : f32 to vector<2x32xf32>
    %133 = arith.cmpf ogt, %131, %132 : vector<2x32xf32>
    %cst_58 = arith.constant 2.000000e-02 : f32
    %134 = vector.broadcast %cst_58 : f32 to vector<2x32xf32>
    %135 = arith.mulf %134, %131 : vector<2x32xf32>
    %136 = arith.select %133, %131, %135 : vector<2x32xi1>, vector<2x32xf32>
    %c0_59 = arith.constant 0 : index
    %c0_60 = arith.constant 0 : index
    %137 = vector.load %arg3[%c0_59, %c0_60] : memref<40x128xf32, #tpu.memory_space<vmem>>, vector<32x128xf32>
    %cst_61 = arith.constant dense<0.000000e+00> : vector<2x128xf32>
    %138 = tpu.matmul %136, %137, %cst_61 {dimension_numbers = #tpu.dot_dimension_numbers<[1], [0], [0], [1], [0, 0, 1, 1], [], []>} : vector<2x32xf32>, vector<32x128xf32>, vector<2x128xf32> -> vector<2x128xf32>
    %c32_62 = arith.constant 32 : index
    %c0_63 = arith.constant 0 : index
    %139 = vector.load %arg3[%c32_62, %c0_63] : memref<40x128xf32, #tpu.memory_space<vmem>>, vector<1x128xf32>
    %140 = vector.broadcast %139 : vector<1x128xf32> to vector<2x128xf32>
    %141 = arith.addf %138, %140 : vector<2x128xf32>
    %c0_64 = arith.constant 0 : index
    %c0_65 = arith.constant 0 : index
    %142 = vector.load %arg4[%c0_64, %c0_65] : memref<2x128xf32, #tpu.memory_space<vmem>>, vector<2x128xf32>
    tpu.vector_store %arg4[%c0_64, %c0_65], %141 {strides = array<i32>} : memref<2x128xf32, #tpu.memory_space<vmem>>, vector<2x128xf32>,
    return
  }
  func.func @transform_0(%arg0: i32) -> (i32, i32) {
    %c0_i32 = arith.constant 0 : i32
    %c0_i32_0 = arith.constant 0 : i32
    return %arg0, %c0_i32 : i32, i32
  }
  func.func @transform_1(%arg0: i32) -> (i32, i32) {
    %c0_i32 = arith.constant 0 : i32
    %c0_i32_0 = arith.constant 0 : i32
    %c0_i32_1 = arith.constant 0 : i32
    return %c0_i32, %c0_i32_0 : i32, i32
  }
  func.func @transform_2(%arg0: i32) -> (i32, i32) {
    %c0_i32 = arith.constant 0 : i32
    %c0_i32_0 = arith.constant 0 : i32
    %c0_i32_1 = arith.constant 0 : i32
    return %c0_i32, %c0_i32_0 : i32, i32
  }
  func.func @transform_3(%arg0: i32) -> (i32, i32) {
    %c0_i32 = arith.constant 0 : i32
    %c0_i32_0 = arith.constant 0 : i32
    return %arg0, %c0_i32 : i32, i32
  }
}

</mosaic_0001>

<bundles_post_ra>
// kernel: forward.1
= control target key start
LH: loop header
LB: loop body
LE: loop exit
PB: predicated region body
PF: predicated region fallthrough
CT: control target
= control target key end

     0   :  { %v629_v1 = vmov 1   ;;  %v630_v2 = vmov 3   ;;  %v631_v3 = vmov 0   ;;  %s844_s0 = inlined_call_operand.vmem [shape: f32[2,256], index: 0, kind: input, shape index: {}]   ;;  %s845_s1 = inlined_call_operand.vmem [shape: f32[96,32], index: 1, kind: input, shape index: {}]   ;;  %s846_s2 = inlined_call_operand.vmem [shape: f32[40,128], index: 2, kind: input, shape index: {}]   ;;  %s847_s3 = inlined_call_operand.hbm [shape: f32[2,128], index: 3, kind: output, shape index: {}]  }
   0x1   :  { %v685_v0 = vld [vmem:[%s844_s0] sm:$0x3]  ;;  %574 = vset.pattern.permute.xlu1 %v629_v1  ;;  %573 = vset.pattern.permute.xlu0 %v630_v2 }
   0x2   :  { %281 = vst [vmem:[#allocation1] ss:$4 sm:$0xff] %v685_v0  ;;  %27 = vperm.xlu1 %574, %v685_v0   ;;  %576 = vset.pattern.permute.xlu2 %v631_v3 }
   0x3   :  { %18 = vperm.xlu2 %576, %v685_v0  }
   0x4   :  { %8 = vsyncpa [#allocation3], 0  ;;  %s632_s14 = smov 104   ;;  %v633_v5 = vmov 2   ;;  %v634_v6 = vmov 9   ;;  %v635_v7 = vmov 10  }
   0x5   :  { %v636_v8 = vmov 18   ;;  %v637_v9 = vmov 17   ;;  %v638_v10 = vmov 11   ;;  %v639_v11 = vmov 12   ;;  %v278_v14 = vld [vmem:[%s845_s1] sm:$0xff]  ;;  %s646_s17 = smov 120  }
   0x6   :  { %v640_v12 = vmov 20   ;;  %v641_v13 = vmov 19   ;;  %303 = vmatpush.msra.mxu0 %v278_v14  ;;  %v642_v15 = vmov 22   ;;  %v643_v16 = vmov 21   ;;  %v721_v33 = vld [vmem:[%s844_s0 + $0x2] sm:$0x3] }
   0x7   :  { %v644_v17 = vmov 13   ;;  %v645_v18 = vmov 269488144   ;;  %vm285_vm0 = vcmask 64512   ;;  %v647_v30 = vmov 15   ;;  %s648_s20 = smov 112  }
   0x8   :  { %v22_v19 = vunpack.c.l.s4 %v645_v18  ;;  %v649_v37 = vmov 8   ;;  %s650_s21 = smov 96   ;;  %v651_v43 = vmov 14   ;;  %v652_v48 = vmov 23   ;;  %s653_s22 = smov 80   ;;  %v371_v60 = vld [vmem:[%s845_s1 + $0x50] sm:$0xff] }
   0x9   :  { %v282_v4 = vld.sshfl [vmem:[#allocation1] sm:$0xff pattern:$0x73625140]  ;;  %v654_v51 = vmov 16   ;;  %s655_s23 = smov 64   ;;  %388 = vmatpush.msra.mxu3 %v371_v60  ;;  %v370_v61 = vld [vmem:[%s845_s1 + $0x48] sm:$0xff] }
   0xa   :  { %283 = vrot.lane.b32.xlu0 %v282_v4, %s632_s14  ;;  %575 = vset.pattern.permute.xlu1 %v633_v5  ;;  %v704_v20 = vunpack.c.0.s8 %v22_v19  ;;  %v369_v62 = vld [vmem:[%s845_s1 + $0x40] sm:$0xff]  ;;  %v368_v1 = vld [vmem:[%s845_s1 + $0x38] sm:$0xff]  ;;  %s656_s5 = smov 48   ;;  %s657_s6 = smov 32   ;;  %vm372_vm2 = vcmask 261120   ;;  %vm399_vm3 = vcmask 130048  }
   0xb   :  { %41 = vperm.xlu1 %575, %v685_v0   ;;  %577 = vset.pattern.permute.xlu2 %v634_v6  ;;  %s658_s9 = smov 16   ;;  %s661_s16 = smov [#allocation2]  }
   0xc   :  { %83 = vperm.xlu2 %577, %v685_v0   ;;  %389 = vmatpush.msra.mxu3 %v370_v61 }
   0xe   :  { %390 = vmatpush.msra.mxu3 %v369_v62 }
  0x10   :  { %391 = vmatpush.msra.mxu3 %v368_v1 }
  0x12   :  { %50 = vperm.xlu0 %573, %v685_v0  }
  0x13   :  { %579 = vset.pattern.permute.xlu1 %v635_v7 }
  0x14   :  { %111 = vperm.xlu1 %579, %v685_v0   ;;  %580 = vset.pattern.permute.xlu2 %v636_v8 }
  0x15   :  { %125 = vperm.xlu2 %580, %v685_v0  }
  0x1a   :  { %578 = vset.pattern.permute.xlu0 %v637_v9 }
  0x1b   :  { %97 = vperm.xlu0 %578, %v685_v0  }
  0x1c   :  { %581 = vset.pattern.permute.xlu1 %v638_v10 }
  0x1d   :  { %139 = vperm.xlu1 %581, %v685_v0   ;;  %582 = vset.pattern.permute.xlu2 %v641_v13 }
  0x1e   :  { %153 = vperm.xlu2 %582, %v685_v0  }
  0x23   :  { %583 = vset.pattern.permute.xlu0 %v639_v11 }
  0x24   :  { %167 = vperm.xlu0 %583, %v685_v0  }
  0x25   :  { %584 = vset.pattern.permute.xlu1 %v640_v12 }
  0x26   :  { %181 = vperm.xlu1 %584, %v685_v0   ;;  %585 = vset.pattern.permute.xlu2 %v644_v17 }
  0x2c   :  { %588 = vset.pattern.permute.xlu0 %v642_v15 }
  0x2d   :  { %237 = vperm.xlu0 %588, %v685_v0  }
  0x2e   :  { %586 = vset.pattern.permute.xlu1 %v643_v16 }
  0x5d   :  { %v710_v25 = vpop.permute.xlu2 %18 }
  0x5e   :  { %v24_v5 = vperm.slane %v710_v25, %v704_v20 }
  0x60   :  { %v25_v7 = vmul.f32 %v24_v5, %v685_v0 }
  0x66   :  { %v84_v31 = vpop.permute.xlu2 %83 }
  0x67   :  { %v89_v32 = vperm.slane %v84_v31, %v704_v20 }
  0x69   :  { %v90_v34 = vmul.f32 %v89_v32, %v721_v33 }
  0x6b   :  { %92 = vrot.lane.b32.xlu0 %v90_v34, %s648_s20 }
  0x6f   :  { %v126_v38 = vpop.permute.xlu2 %125 }
  0x70   :  { %v131_v40 = vperm.slane %v126_v38, %v704_v20  ;;  %v313_v38 = vld [vmem:[%s845_s1 + $0x10] sm:$0xff] }
  0x71   :  { %336 = vmatpush.msra.mxu1 %v313_v38 }
  0x72   :  { %v132_v41 = vmul.f32 %v131_v40, %v721_v33 }
  0x74   :  { %v28_v21 = vpop.permute.xlu1 %27  ;;  %134 = vrot.lane.b32.xlu0 %v132_v41, %s650_s21 }
  0x75   :  { %v33_v22 = vperm.slane %v28_v21, %v704_v20 }
  0x77   :  { %v34_v23 = vmul.f32 %v33_v22, %v685_v0  ;;  %v596_v22 = vld [vmem:[%s845_s1 + $0x58] ss:$0 sm:$0xff] }
  0x78   :  { %v154_v54 = vpop.permute.xlu2 %153 }
  0x79   :  { %36 = vrot.lane.b32.xlu1 %v34_v23, %s646_s17  ;;  %v159_v55 = vperm.slane %v154_v54, %v704_v20  ;;  %v659_v54 = vmov 48  }
  0x7b   :  { %v160_v56 = vmul.f32 %v159_v55, %v721_v33 }
  0x7c   :  { %v284_v24 = vpop.permute.xlu0 %283 }
  0x7d   :  { %533 = vmatmul.msk.f32.vlgmr.msra.gmra.mxu0 %vm285_vm0, %v284_v24  ;;  %v713_v28 = vpop.permute.xlu1 %41  ;;  %162 = vrot.lane.b32.xlu0 %v160_v56, %s653_s22 }
  0x7e   :  { %v47_v63 = vperm.slane %v713_v28, %v704_v20 }
  0x80   :  { %v48_v2 = vmul.f32 %v47_v63, %v685_v0 }
  0x81   :  { %209 = vperm.xlu1 %586, %v685_v0  }
  0x84   :  { %v51_v26 = vpop.permute.xlu0 %50 }
  0x85   :  { %v56_v27 = vperm.slane %v51_v26, %v704_v20 }
  0x86   :  { %v112_v35 = vpop.permute.xlu1 %111 }
  0x87   :  { %v57_v29 = vmul.f32 %v56_v27, %v685_v0  ;;  %v117_v52 = vperm.slane %v112_v35, %v704_v20  ;;  %v312_v35 = vld [vmem:[%s845_s1 + $0x8] sm:$0xff] }
  0x88   :  { %363 = vmatpush.msra.mxu2 %v312_v35 }
  0x89   :  { %59 = vrot.lane.b32.xlu2 %v57_v29, %s646_s17  ;;  %589 = vset.pattern.permute.xlu1 %v647_v30  ;;  %v118_v53 = vmul.f32 %v117_v52, %v721_v33  ;;  %s522_s17 = sshll.u32 %s661_s16, 4  ;;  %s523_s17 = int_to_ptr.vmem [resolvable:$true] %s522_s17 }
  0x8a   :  { %251 = vperm.xlu1 %589, %v685_v0  }
  0x8d   :  { %v98_v36 = vpop.permute.xlu0 %97 }
  0x8e   :  { %v103_v39 = vperm.slane %v98_v36, %v704_v20 }
  0x8f   :  { %v140_v44 = vpop.permute.xlu1 %139 }
  0x90   :  { %v104_v42 = vmul.f32 %v103_v39, %v721_v33  ;;  %v145_v45 = vperm.slane %v140_v44, %v704_v20 }
  0x91   :  { %195 = vperm.xlu2 %585, %v685_v0  }
  0x92   :  { %591 = vset.pattern.permute.xlu1 %v649_v37  ;;  %v146_v46 = vmul.f32 %v145_v45, %v721_v33  ;;  %v397_v45 = vld [vmem:[%s845_s1 + $0x18] sm:$0xff] }
  0x93   :  { %65 = vperm.xlu1 %591, %v685_v0  }
  0x96   :  { %v168_v47 = vpop.permute.xlu0 %167 }
  0x97   :  { %v173_v49 = vperm.slane %v168_v47, %v704_v20 }
  0x98   :  { %v182_v57 = vpop.permute.xlu1 %181 }
  0x99   :  { %587 = vset.pattern.permute.xlu2 %v651_v43  ;;  %v174_v50 = vmul.f32 %v173_v49, %v721_v33  ;;  %v187_v58 = vperm.slane %v182_v57, %v704_v20  ;;  %v398_v43 = vld [vmem:[%s845_s1 + $0x20] sm:$0xff] }
  0x9a   :  { %223 = vperm.xlu2 %587, %v685_v0   ;;  %417 = vmatpush.msrb.mxu0 %v398_v43  ;;  %v601_v43 = vld [vmem:[%s845_s1 + $0x5b] ss:$0 sm:$0xff] }
  0x9b   :  { %106 = vrot.lane.b32.xlu1 %v104_v42, %s648_s20  ;;  %v188_v59 = vmul.f32 %v187_v58, %v721_v33  ;;  %s524_s20 = sshll.u32 %s847_s3, 4  ;;  %s525_s20 = int_to_ptr.hbm [resolvable:$true] %s524_s20 }
  0x9c   :  { %418 = vmatpush.msrb.mxu0 %v397_v45  ;;  %593 = vset.pattern.permute.xlu1 %v659_v54 }
  0x9f   :  { %v238_v8 = vpop.permute.xlu0 %237 }
  0xa0   :  { %v243_v14 = vperm.slane %v238_v8, %v704_v20 }
  0xa2   :  { %590 = vset.pattern.permute.xlu2 %v652_v48  ;;  %v244_v15 = vmul.f32 %v243_v14, %v721_v33  ;;  %v424_v48 = vld [vmem:[%s845_s1 + $0x28] sm:$0xff] }
  0xa3   :  { %265 = vperm.xlu2 %590, %v685_v0   ;;  %148 = vrot.lane.b32.xlu1 %v146_v46, %s653_s22  ;;  %v425_v46 = vld [vmem:[%s845_s1 + $0x30] sm:$0xff] }
  0xa4   :  { %443 = vmatpush.msrb.mxu1 %v425_v46 }
  0xa6   :  { %444 = vmatpush.msrb.mxu1 %v424_v48 }
  0xab   :  { %592 = vset.pattern.permute.xlu2 %v654_v51  ;;  %176 = vrot.lane.b32.xlu1 %v174_v50, %s655_s23  ;;  %v311_v51 = vld [vmem:[%s844_s0] sm:$0x3] }
  0xac   :  { %74 = vperm.xlu2 %592, %v685_v0  }
  0xb4   :  { %120 = vrot.lane.b32.xlu2 %v118_v53, %s650_s21 }
  0xbc   :  { %190 = vrot.lane.b32.xlu2 %v188_v59, %s655_s23 }
  0xdd   :  { %v93_v41 = vpop.permute.xlu0 %92 }
  0xe3   :  { %v60_v3 = vpop.permute.xlu2 %59 }
  0xe4   :  { %v62_v4 = vadd.f32 %v60_v3, %v48_v2  ;;  %v660_v2 = vmov 49  }
  0xe5   :  { %594 = vset.pattern.permute.xlu2 %v660_v2  ;;  %595 = vset.pattern.permute.xlu0 %v660_v2 }
  0xe6   :  { %315 = vst [vmem:[#allocation1] ss:$4 sm:$0xff] %v62_v4  ;;  %v135_v47 = vpop.permute.xlu0 %134 }
  0xeb   :  { %v196_v6 = vpop.permute.xlu2 %195  ;;  %v37_v10 = vpop.permute.xlu1 %36 }
  0xec   :  { %v201_v9 = vperm.slane %v196_v6, %v704_v20  ;;  %v39_v11 = vadd.f32 %v37_v10, %v25_v7 }
  0xed   :  { %v316_v12 = vld.sshfl [vmem:[#allocation1] sm:$0xff pattern:$0x73625140] }
  0xee   :  { %v202_v13 = vmul.f32 %v201_v9, %v721_v33  ;;  %317 = vrot.lane.b32.xlu1 %v316_v12, %s650_s21  ;;  %342 = vst [vmem:[#allocation1] ss:$4 sm:$0xff] %v39_v11 }
  0xef   :  { %v163_v55 = vpop.permute.xlu0 %162 }
  0xf0   :  { %204 = vrot.lane.b32.xlu0 %v202_v13, %s656_s5 }
  0xf3   :  { %v210_v16 = vpop.permute.xlu1 %209 }
  0xf4   :  { %v224_v17 = vpop.permute.xlu2 %223  ;;  %v215_v0 = vperm.slane %v210_v16, %v704_v20  ;;  %v490_v16 = vld [vmem:[%s846_s2 + $0x18] sm:$0xff] }
  0xf5   :  { %v229_v18 = vperm.slane %v224_v17, %v704_v20  ;;  %v343_v31 = vld.sshfl [vmem:[#allocation1] sm:$0xff pattern:$0x73625140]  ;;  %508 = vmatpush.msrb.mxu2 %v490_v16  ;;  %v489_v17 = vld [vmem:[%s846_s2 + $0x10] sm:$0xff] }
  0xf6   :  { %246 = vrot.lane.b32.xlu1 %v244_v15, %s657_s6  ;;  %v216_v19 = vmul.f32 %v215_v0, %v721_v33  ;;  %v488_v0 = vld [vmem:[%s846_s2 + $0x8] sm:$0xff] }
  0xf7   :  { %v230_v21 = vmul.f32 %v229_v18, %v721_v33  ;;  %509 = vmatpush.msrb.mxu2 %v489_v17  ;;  %v487_v18 = vld [vmem:[%s846_s2] sm:$0xff] }
  0xf8   :  { %218 = vrot.lane.b32.xlu2 %v216_v19, %s656_s5 }
  0xf9   :  { %232 = vrot.lane.b32.xlu0 %v230_v21, %s657_s6  ;;  %510 = vmatpush.msrb.mxu2 %v488_v0 }
  0xfa   :  { %v305_v23 = vpop.f32.mrf.mxu0 }
  0xfb   :  { %v306_v24 = vadd.f32 %v596_v22, %v305_v23  ;;  %511 = vmatpush.msrb.mxu2 %v487_v18 }
  0xfc   :  { %v252_v28 = vpop.permute.xlu1 %251 }
  0xfd   :  { %v309_v25 = vmul.f32 0.02, %v306_v24  ;;  %v266_v26 = vpop.permute.xlu2 %265  ;;  %vm308_vm1 = vcmp.gt.f32.partialorder %v306_v24, 0.0  ;;  %v257_v32 = vperm.slane %v252_v28, %v704_v20  ;;  %v597_v28 = vld [vmem:[%s845_s1 + $0x5c] ss:$0 sm:$0xff] }
  0xfe   :  { %v271_v27 = vperm.slane %v266_v26, %v704_v20  ;;  %456 = vperm.xlu1 %593, %v311_v51  }
  0xff   :  { %v310_v29 = vsel %vm308_vm1, %v306_v24, %v309_v25  ;;  %v258_v34 = vmul.f32 %v257_v32, %v721_v33  ;;  %v599_v32 = vld [vmem:[%s845_s1 + $0x5d] ss:$0 sm:$0xff] }
 0x100   :  { %v272_v30 = vmul.f32 %v271_v27, %v721_v33  ;;  %536 = vmatmul.msk.f32.vlgmr.msra.gmra.mxu3 %vm372_vm2, %v310_v29  ;;  %344 = vrot.lane.b32.xlu2 %v343_v31, %s650_s21  ;;  %v598_v31 = vld [vmem:[%s845_s1 + $0x59] ss:$0 sm:$0xff] }
 0x102   :  { %274 = vrot.lane.b32.xlu0 %v272_v30, %s658_s9 }
 0x105   :  { %v66_v37 = vpop.permute.xlu1 %65 }
 0x106   :  { %v75_v36 = vpop.permute.xlu2 %74  ;;  %v71_v50 = vperm.slane %v66_v37, %v704_v20 }
 0x107   :  { %v80_v56 = vperm.slane %v75_v36, %v704_v20 }
 0x108   :  { %260 = vrot.lane.b32.xlu2 %v258_v34, %s658_s9  ;;  %v72_v52 = vmul.f32 %v71_v50, %v721_v33 }
 0x109   :  { %v81_v59 = vmul.f32 %v80_v56, %v721_v33 }
 0x10a   :  { %v95_v58 = vadd.f32 %v93_v41, %v72_v52  ;;  %v600_v41 = vld [vmem:[%s845_s1 + $0x5a] ss:$0 sm:$0xff] }
 0x10d   :  { %v107_v40 = vpop.permute.xlu1 %106 }
 0x10e   :  { %v121_v39 = vpop.permute.xlu2 %120  ;;  %v109_v63 = vadd.f32 %v107_v40, %v81_v59 }
 0x10f   :  { %v123_v60 = vadd.f32 %v121_v39, %v95_v58 }
 0x110   :  { %468 = vperm.xlu2 %594, %v311_v51   ;;  %v137_v3 = vadd.f32 %v135_v47, %v109_v63  ;;  %v602_v47 = vld [vmem:[%s846_s2 + $0x20] ss:$0 sm:$0xff] }
 0x112   :  { %v165_v6 = vadd.f32 %v163_v55, %v137_v3 }
 0x115   :  { %v149_v44 = vpop.permute.xlu1 %148 }
 0x116   :  { %v191_v42 = vpop.permute.xlu2 %190  ;;  %v151_v1 = vadd.f32 %v149_v44, %v123_v60 }
 0x117   :  { %v193_v10 = vadd.f32 %v191_v42, %v165_v6 }
 0x11d   :  { %v177_v53 = vpop.permute.xlu1 %176 }
 0x11e   :  { %v179_v4 = vadd.f32 %v177_v53, %v151_v1 }
 0x152   :  { %v219_v49 = vpop.permute.xlu2 %218 }
 0x153   :  { %v221_v12 = vadd.f32 %v219_v49, %v193_v10 }
 0x15a   :  { %v345_v57 = vpop.permute.xlu2 %344 }
 0x15b   :  { %535 = vmatmul.msk.f32.vlgmr.msra.gmra.mxu2 %vm285_vm0, %v345_v57 }
 0x160   :  { %v318_v61 = vpop.permute.xlu1 %317 }
 0x161   :  { %534 = vmatmul.msk.f32.vlgmr.msra.gmra.mxu1 %vm285_vm0, %v318_v61 }
 0x162   :  { %v205_v62 = vpop.permute.xlu0 %204  ;;  %v261_v8 = vpop.permute.xlu2 %260 }
 0x163   :  { %v207_v5 = vadd.f32 %v205_v62, %v179_v4 }
 0x168   :  { %v247_v11 = vpop.permute.xlu1 %246 }
 0x169   :  { %v249_v13 = vadd.f32 %v247_v11, %v221_v12 }
 0x16a   :  { %v469_v26 = vpop.permute.xlu2 %468 }
 0x16b   :  { %v233_v7 = vpop.permute.xlu0 %232  ;;  %v474_v34 = vperm.slane %v469_v26, %v704_v20 }
 0x16c   :  { %v235_v9 = vadd.f32 %v233_v7, %v207_v5 }
 0x16d   :  { %v476_v39 = vmul.f32 %v599_v32, %v474_v34 }
 0x16e   :  { %v263_v33 = vadd.f32 %v261_v8, %v235_v9 }
 0x170   :  { %537 = vmatmul.msk.f32.vlgmr.msrb.gmra.mxu0 %vm399_vm3, %v263_v33  ;;  %v457_v23 = vpop.permute.xlu1 %456 }
 0x171   :  { %v462_v29 = vperm.slane %v457_v23, %v704_v20 }
 0x173   :  { %v464_v36 = vmul.f32 %v597_v28, %v462_v29 }
 0x174   :  { %v275_v14 = vpop.permute.xlu0 %274 }
 0x175   :  { %v277_v15 = vadd.f32 %v275_v14, %v249_v13 }
 0x177   :  { %538 = vmatmul.msk.f32.vlgmr.msrb.gmra.mxu1 %vm399_vm3, %v277_v15 }
 0x183   :  { %v393_v24 = vpop.f32.mrf.mxu3 }
 0x1de   :  { %v338_v19 = vpop.f32.mrf.mxu1  ;;  %v365_v21 = vpop.f32.mrf.mxu2 }
 0x1df   :  { %v366_v22 = vadd.f32 %v365_v21, %v338_v19 }
 0x1e1   :  { %v396_v27 = vadd.f32 %v393_v24, %v366_v22 }
 0x1ed   :  { %v420_v25 = vpop.f32.mrf.mxu0 }
 0x1ee   :  { %v423_v30 = vadd.f32 %v420_v25, %v396_v27 }
 0x1f4   :  { %v446_v35 = vpop.f32.mrf.mxu1 }
 0x1f5   :  { %v449_v37 = vadd.f32 %v446_v35, %v423_v30 }
 0x1f7   :  { %v452_v38 = vadd.f32 %v598_v31, %v449_v37 }
 0x1f9   :  { %v465_v40 = vadd.f32 %v464_v36, %v452_v38 }
 0x1fb   :  { %v477_v42 = vadd.f32 %v476_v39, %v465_v40 }
 0x1fd   :  { %v480_v44 = vmul.f32 %v600_v41, %v477_v42 }
 0x1ff   :  { %v483_v45 = vadd.f32 %v601_v43, %v480_v44 }
 0x201   :  { %vm484_vm4 = vcmp.gt.f32.partialorder %v483_v45, 0.0  ;;  %v485_v46 = vmul.f32 0.02, %v483_v45 }
 0x203   :  { %v486_v20 = vsel %vm484_vm4, %v483_v45, %v485_v46 }
 0x204   :  { %539 = vmatmul.msk.f32.vlgmr.msrb.gmra.mxu2 %vm372_vm2, %v486_v20 }
 0x287   :  { %v513_v48 = vpop.f32.mrf.mxu2 }
 0x288   :  { %v514_v49 = vadd.f32 %v602_v47, %v513_v48 }
 0x28a   :  { %516 = vst [vmem:[#allocation2] sm:$0x3] %v514_v49 }
 0x28b   :  { %527 = dma.vmem_to_hbm [thread:$0]  %s523_s17, 32, %s525_s20, [#allocation3]  }
 0x28c   :  { %627 = dma.done.wait [#allocation3], 32  }
 0x28d   :  { %628 = vsyncadd [#allocation3], 4294967264 }
 0x28e   :  { %532 = vsyncpa [#allocation3], 1 }

</bundles_post_ra>
